<compile_context>
chip_gen: v7x
topology: tpu7x:2x2x1
jax: 0.10.0
libtpu: 0.0.40
codegen_flags: <defaults>
</compile_context>

<pallas_src>
import functools
import math

import jax
import jax.numpy as jnp
from jax.experimental import pallas as pl
from jax.experimental.pallas import tpu as pltpu


def bert_attention_kernel(x_ref, mask_ref, wqkv_ref, bqkv_ref, wo_ref, bo_ref,
                          gamma_ref, beta_ref, o_ref, q_scr, k_scr, v_scr,
                          *, num_heads, eps):
    # x_ref:    (1, S, H)  full sequence (resident across q-tiles of one batch)
    # mask_ref: (1, 1, S)  additive attention mask (broadcast over queries)
    # wqkv_ref: (H, 3H) bf16   bqkv_ref: (1, 3H) f32
    # wo_ref:   (H, H)  bf16   bo/gamma/beta: (1, H) f32
    # o_ref:    (1, TQ, H)
    # q_scr/k_scr/v_scr: (N, S, D) bf16 VMEM scratch, filled once per batch.
    qi = pl.program_id(1)
    _, TQ, H = o_ref.shape
    S = x_ref.shape[1]
    N = num_heads
    D = H // N
    scale = 1.0 / math.sqrt(D)

    @pl.when(qi == 0)
    def _project_qkv():
        # Fused QKV projection for the whole sequence: one MXU RHS push,
        # lane-dense (S, 3H) output, f32 accumulation.
        x_bf = x_ref[0].astype(jnp.bfloat16)                               # (S, H)
        qkv = jnp.dot(x_bf, wqkv_ref[...],
                      preferred_element_type=jnp.float32) + bqkv_ref[...]  # (S, 3H)

        def to_heads(t):  # (S, H) -> (N, S, D): heads on the leading axis.
            return jnp.transpose(t.astype(jnp.bfloat16).reshape(S, N, D), (1, 0, 2))

        q_scr[...] = to_heads(qkv[:, :H] * scale)   # fold 1/sqrt(D) into q once
        k_scr[...] = to_heads(qkv[:, H:2 * H])
        v_scr[...] = to_heads(qkv[:, 2 * H:])

    q0 = pl.multiple_of(qi * TQ, TQ)
    qh = q_scr[:, pl.ds(q0, TQ), :]                 # (N, TQ, D) bf16, pre-scaled
    kh = k_scr[...]                                 # (N, S, D)  bf16
    vh = v_scr[...]                                 # (N, S, D)  bf16

    # All heads in one batched MXU matmul, f32 accumulate.
    s = jnp.einsum('ntd,nsd->nts', qh, kh,
                   preferred_element_type=jnp.float32)                     # (N, TQ, S)
    s = s + mask_ref[0].astype(jnp.float32)                                # (1, S) bcast

    # Stable softmax; divide goes to the EUP via approximate reciprocal.
    m = jnp.max(s, axis=-1, keepdims=True)
    p = jnp.exp(s - m)
    denom = jnp.sum(p, axis=-1, keepdims=True)
    probs = (p * pl.reciprocal(denom, approx=True)).astype(jnp.bfloat16)
    # TODO(synk): attention-prob dropout omitted (eval/inference => identity).

    ctx = jnp.einsum('nts,nsd->ntd', probs, vh,
                     preferred_element_type=jnp.float32)                   # (N, TQ, D)
    ctx = jnp.transpose(ctx, (1, 0, 2)).reshape(TQ, H)                     # (TQ, H)

    # BertSelfOutput: dense + residual + LayerNorm (all non-MXU math in f32).
    dense = jnp.dot(ctx.astype(jnp.bfloat16), wo_ref[...],
                    preferred_element_type=jnp.float32) + bo_ref[...]
    # TODO(synk): hidden dropout omitted (eval/inference => identity).
    x_tile = x_ref[0, pl.ds(q0, TQ), :].astype(jnp.float32)                # residual
    y = dense + x_tile
    mu = jnp.mean(y, axis=-1, keepdims=True)
    var = jnp.mean(jnp.square(y - mu), axis=-1, keepdims=True)
    out = (y - mu) * jax.lax.rsqrt(var + eps) * gamma_ref[...] + beta_ref[...]
    o_ref[0] = out.astype(o_ref.dtype)


def bert_attention(hidden_states, attention_mask, params, *, num_heads,
                   eps=1e-12, q_tile=256):
    """hidden_states: [B, S, H] ; attention_mask: [B, 1, 1, S] additive mask.

    params: wq/wk/wv/wo stored [H_in, H_out] (transposed vs torch's [out, in]),
    bq/bk/bv/bo [H], ln_gamma/ln_beta [H].  Returns [B, S, H]."""
    B, S, H = hidden_states.shape
    N = num_heads
    D = H // N
    TQ = min(q_tile, S)
    assert S % TQ == 0, "sequence length must be divisible by the query tile"
    NQ = S // TQ

    mask = attention_mask.reshape(B, 1, S)

    # Fused QKV weight/bias; all MXU weights downcast to bf16 in the wrapper
    # (halves weight VMEM + DMA bytes); biases / LN params stay f32.
    wqkv = jnp.concatenate(
        [params["wq"], params["wk"], params["wv"]], axis=1).astype(jnp.bfloat16)
    bqkv = jnp.concatenate(
        [params["bq"], params["bk"], params["bv"]]).reshape(1, 3 * H).astype(jnp.float32)
    wo = params["wo"].astype(jnp.bfloat16)

    def row(p):  # (H,) -> (1, H) lane vector, f32
        return p.reshape(1, H).astype(jnp.float32)

    const2d = lambda shape: pl.BlockSpec(shape, lambda b, qi: (0, 0))  # resident

    kernel = functools.partial(bert_attention_kernel, num_heads=num_heads, eps=eps)

    return pl.pallas_call(
        kernel,
        out_shape=jax.ShapeDtypeStruct((B, S, H), hidden_states.dtype),
        grid=(B, NQ),
        in_specs=[
            pl.BlockSpec((1, S, H), lambda b, qi: (b, 0, 0)),   # x (full seq, per batch)
            pl.BlockSpec((1, 1, S), lambda b, qi: (b, 0, 0)),   # additive mask
            const2d((H, 3 * H)),                                # W_qkv  (bf16, resident)
            const2d((1, 3 * H)),                                # b_qkv
            const2d((H, H)),                                    # W_o    (bf16, resident)
            const2d((1, H)),                                    # b_o
            const2d((1, H)),                                    # LN gamma
            const2d((1, H)),                                    # LN beta
        ],
        out_specs=pl.BlockSpec((1, TQ, H), lambda b, qi: (b, qi, 0)),
        scratch_shapes=[
            pltpu.VMEM((N, S, D), jnp.bfloat16),    # q (pre-scaled)
            pltpu.VMEM((N, S, D), jnp.bfloat16),    # k
            pltpu.VMEM((N, S, D), jnp.bfloat16),    # v
        ],
        compiler_params=pltpu.CompilerParams(
            # batch: megacore-parallel; q-tiles: sequential (scratch reuse per batch)
            dimension_semantics=("parallel", "arbitrary"),
            vmem_limit_bytes=32 * 1024 * 1024,
        ),
    )(hidden_states, mask, wqkv, bqkv, wo, row(params["bo"]),
      row(params["ln_gamma"]), row(params["ln_beta"]))


def bert_attention_ref(x, mask, params, *, num_heads, eps=1e-12):
    """Pure-JAX f32 reference mirroring the PyTorch module."""
    B, S, H = x.shape
    D = H // num_heads
    q = x @ params["wq"] + params["bq"]
    k = x @ params["wk"] + params["bk"]
    v = x @ params["wv"] + params["bv"]

    def split_heads(t):
        return t.reshape(B, S, num_heads, D).transpose(0, 2, 1, 3)

    qh, kh, vh = split_heads(q), split_heads(k), split_heads(v)
    scores = jnp.einsum('bntd,bnsd->bnts', qh, kh) / math.sqrt(D)
    scores = scores + mask                                # (B, 1, 1, S) broadcast
    probs = jax.nn.softmax(scores, axis=-1)
    ctx = jnp.einsum('bnts,bnsd->bntd', probs, vh)
    ctx = ctx.transpose(0, 2, 1, 3).reshape(B, S, H)
    dense = ctx @ params["wo"] + params["bo"]
    y = dense + x
    mu = jnp.mean(y, axis=-1, keepdims=True)
    var = jnp.mean(jnp.square(y - mu), axis=-1, keepdims=True)
    return (y - mu) * jax.lax.rsqrt(var + eps) * params["ln_gamma"] + params["ln_beta"]


if __name__ == "__main__":
    # Small synthetic config: batch=2, seq=8, hidden=32, heads=4 (head_dim=8).
    B, S, H, N = 2, 8, 32, 4

    key = jax.random.PRNGKey(0)
    keys = jax.random.split(key, 12)
    scale = 0.05

    params = {
        "wq": scale * jax.random.normal(keys[0], (H, H), jnp.float32),
        "bq": scale * jax.random.normal(keys[1], (H,), jnp.float32),
        "wk": scale * jax.random.normal(keys[2], (H, H), jnp.float32),
        "bk": scale * jax.random.normal(keys[3], (H,), jnp.float32),
        "wv": scale * jax.random.normal(keys[4], (H, H), jnp.float32),
        "bv": scale * jax.random.normal(keys[5], (H,), jnp.float32),
        "wo": scale * jax.random.normal(keys[6], (H, H), jnp.float32),
        "bo": scale * jax.random.normal(keys[7], (H,), jnp.float32),
        "ln_gamma": jnp.ones((H,), jnp.float32),
        "ln_beta": jnp.zeros((H,), jnp.float32),
    }

    hidden_states = jax.random.normal(keys[8], (B, S, H), jnp.float32)

    # Additive attention mask [B, 1, 1, S]: batch 0 fully valid, batch 1 masks
    # the last 2 key positions (standard BERT extended mask convention).
    valid = jnp.array([[1.0] * S, [1.0] * (S - 2) + [0.0] * 2], jnp.float32)
    attention_mask = ((1.0 - valid) * -10000.0).reshape(B, 1, 1, S)

    out = bert_attention(hidden_states, attention_mask, params, num_heads=N)
    jax.block_until_ready(out)

    ref = bert_attention_ref(hidden_states, attention_mask, params, num_heads=N)
    assert out.shape == (B, S, H)
    # Kernel feeds the MXU bf16 operands (f32 accumulation), so compare against the
    # f32 reference with a tolerance covering bf16 operand rounding.
    err = jnp.max(jnp.abs(out - ref))
    assert jnp.allclose(out, ref, atol=2e-2, rtol=2e-2), f"max abs err = {err}"

    print("KERNEL_OK")
</pallas_src>

<mosaic_0001>
module attributes {stable_mosaic.version = 11 : i64} {
  func.func @bert_attention_kernel(%arg0: i32, %arg1: i32, %arg2: memref<1x8x32xf32, #tpu.memory_space<vmem>>, %arg3: memref<1x1x8xf32, #tpu.memory_space<vmem>>, %arg4: memref<32x96xbf16, #tpu.memory_space<vmem>>, %arg5: memref<1x96xf32, #tpu.memory_space<vmem>>, %arg6: memref<32x32xbf16, #tpu.memory_space<vmem>>, %arg7: memref<1x32xf32, #tpu.memory_space<vmem>>, %arg8: memref<1x32xf32, #tpu.memory_space<vmem>>, %arg9: memref<1x32xf32, #tpu.memory_space<vmem>>, %arg10: memref<1x8x32xf32, #tpu.memory_space<vmem>>, %arg11: memref<4x8x8xbf16, #tpu.memory_space<vmem>>, %arg12: memref<4x8x8xbf16, #tpu.memory_space<vmem>>, %arg13: memref<4x8x8xbf16, #tpu.memory_space<vmem>>) attributes {dimension_semantics = [#tpu.dimension_semantics<parallel>, #tpu.dimension_semantics<arbitrary>], iteration_bounds = array<i64: 2, 1>, scalar_prefetch = 0 : i64, scratch_operands = 3 : i64, tpu.core_type = #tpu.core_type<tc>, window_params = [{transform_indices = @transform_0, window_bounds = array<i64: 1, 8, 32>}, {transform_indices = @transform_1, window_bounds = array<i64: 1, 1, 8>}, {pipeline_mode = #tpu.pipeline_mode<synchronous>, transform_indices = @transform_2, window_bounds = array<i64: 32, 96>}, {pipeline_mode = #tpu.pipeline_mode<synchronous>, transform_indices = @transform_3, window_bounds = array<i64: 1, 96>}, {pipeline_mode = #tpu.pipeline_mode<synchronous>, transform_indices = @transform_4, window_bounds = array<i64: 32, 32>}, {pipeline_mode = #tpu.pipeline_mode<synchronous>, transform_indices = @transform_5, window_bounds = array<i64: 1, 32>}, {pipeline_mode = #tpu.pipeline_mode<synchronous>, transform_indices = @transform_6, window_bounds = array<i64: 1, 32>}, {pipeline_mode = #tpu.pipeline_mode<synchronous>, transform_indices = @transform_7, window_bounds = array<i64: 1, 32>}, {transform_indices = @transform_8, window_bounds = array<i64: 1, 8, 32>}]} {
    %c0_i32 = arith.constant 0 : i32
    %0 = arith.cmpi eq, %arg1, %c0_i32 : i32
    %1 = arith.extui %0 : i1 to i32
    %c0_i32_0 = arith.constant 0 : i32
    %2 = arith.cmpi ne, %1, %c0_i32_0 : i32
    scf.if %2 {
      %c0_33 = arith.constant 0 : index
      %c0_34 = arith.constant 0 : index
      %c0_35 = arith.constant 0 : index
      %66 = vector.load %arg2[%c0_33, %c0_34, %c0_35] : memref<1x8x32xf32, #tpu.memory_space<vmem>>, vector<1x8x32xf32>
      %67 = vector.shape_cast %66 : vector<1x8x32xf32> to vector<8x32xf32>
      %68 = arith.truncf %67 : vector<8x32xf32> to vector<8x32xbf16>
      %c0_36 = arith.constant 0 : index
      %c0_37 = arith.constant 0 : index
      %69 = vector.load %arg4[%c0_36, %c0_37] : memref<32x96xbf16, #tpu.memory_space<vmem>>, vector<32x96xbf16>
      %cst_38 = arith.constant dense<0.000000e+00> : vector<8x96xf32>
      %70 = tpu.matmul %68, %69, %cst_38 {dimension_numbers = #tpu.dot_dimension_numbers<[1], [0], [0], [1], [0, 0, 1, 1], [], []>} : vector<8x32xbf16>, vector<32x96xbf16>, vector<8x96xf32> -> vector<8x96xf32>
      %c0_39 = arith.constant 0 : index
      %c0_40 = arith.constant 0 : index
      %71 = vector.load %arg5[%c0_39, %c0_40] : memref<1x96xf32, #tpu.memory_space<vmem>>, vector<1x96xf32>
      %72 = vector.broadcast %71 : vector<1x96xf32> to vector<8x96xf32>
      %73 = arith.addf %70, %72 : vector<8x96xf32>
      %74 = vector.extract_strided_slice %73 {offsets = [0, 0], sizes = [8, 32], strides = [1, 1]} : vector<8x96xf32> to vector<8x32xf32>
      %cst_41 = arith.constant 0.353553385 : f32
      %75 = vector.broadcast %cst_41 : f32 to vector<8x32xf32>
      %76 = arith.mulf %74, %75 : vector<8x32xf32>
      %77 = arith.truncf %76 : vector<8x32xf32> to vector<8x32xbf16>
      %78 = vector.shape_cast %77 : vector<8x32xbf16> to vector<8x4x8xbf16>
      %79 = tpu.transpose %78, [1, 0, 2] : vector<8x4x8xbf16> -> vector<4x8x8xbf16>
      %c0_42 = arith.constant 0 : index
      %c0_43 = arith.constant 0 : index
      %c0_44 = arith.constant 0 : index
      %80 = vector.load %arg11[%c0_42, %c0_43, %c0_44] : memref<4x8x8xbf16, #tpu.memory_space<vmem>>, vector<4x8x8xbf16>
      tpu.vector_store %arg11[%c0_42, %c0_43, %c0_44], %79 {strides = array<i32>} : memref<4x8x8xbf16, #tpu.memory_space<vmem>>, vector<4x8x8xbf16>,
      %81 = vector.extract_strided_slice %73 {offsets = [0, 32], sizes = [8, 32], strides = [1, 1]} : vector<8x96xf32> to vector<8x32xf32>
      %82 = arith.truncf %81 : vector<8x32xf32> to vector<8x32xbf16>
      %83 = vector.shape_cast %82 : vector<8x32xbf16> to vector<8x4x8xbf16>
      %84 = tpu.transpose %83, [1, 0, 2] : vector<8x4x8xbf16> -> vector<4x8x8xbf16>
      %c0_45 = arith.constant 0 : index
      %c0_46 = arith.constant 0 : index
      %c0_47 = arith.constant 0 : index
      %85 = vector.load %arg12[%c0_45, %c0_46, %c0_47] : memref<4x8x8xbf16, #tpu.memory_space<vmem>>, vector<4x8x8xbf16>
      tpu.vector_store %arg12[%c0_45, %c0_46, %c0_47], %84 {strides = array<i32>} : memref<4x8x8xbf16, #tpu.memory_space<vmem>>, vector<4x8x8xbf16>,
      %86 = vector.extract_strided_slice %73 {offsets = [0, 64], sizes = [8, 32], strides = [1, 1]} : vector<8x96xf32> to vector<8x32xf32>
      %87 = arith.truncf %86 : vector<8x32xf32> to vector<8x32xbf16>
      %88 = vector.shape_cast %87 : vector<8x32xbf16> to vector<8x4x8xbf16>
      %89 = tpu.transpose %88, [1, 0, 2] : vector<8x4x8xbf16> -> vector<4x8x8xbf16>
      %c0_48 = arith.constant 0 : index
      %c0_49 = arith.constant 0 : index
      %c0_50 = arith.constant 0 : index
      %90 = vector.load %arg13[%c0_48, %c0_49, %c0_50] : memref<4x8x8xbf16, #tpu.memory_space<vmem>>, vector<4x8x8xbf16>
      tpu.vector_store %arg13[%c0_48, %c0_49, %c0_50], %89 {strides = array<i32>} : memref<4x8x8xbf16, #tpu.memory_space<vmem>>, vector<4x8x8xbf16>,
    } else {
    }
    %c8_i32 = arith.constant 8 : i32
    %3 = arith.muli %arg1, %c8_i32 : i32
    %4 = tpu.assume_multiple %3, 8 : i32
    %c0 = arith.constant 0 : index
    %5 = arith.index_cast %4 : i32 to index
    %c0_1 = arith.constant 0 : index
    %6 = vector.load %arg11[%c0, %5, %c0_1] : memref<4x8x8xbf16, #tpu.memory_space<vmem>>, vector<4x8x8xbf16>
    %c0_2 = arith.constant 0 : index
    %c0_3 = arith.constant 0 : index
    %c0_4 = arith.constant 0 : index
    %7 = vector.load %arg12[%c0_2, %c0_3, %c0_4] : memref<4x8x8xbf16, #tpu.memory_space<vmem>>, vector<4x8x8xbf16>
    %c0_5 = arith.constant 0 : index
    %c0_6 = arith.constant 0 : index
    %c0_7 = arith.constant 0 : index
    %8 = vector.load %arg13[%c0_5, %c0_6, %c0_7] : memref<4x8x8xbf16, #tpu.memory_space<vmem>>, vector<4x8x8xbf16>
    "tpu.trace_start"() <{level = 10 : i32, message = "ntd,nsd->nts"}> : () -> ()
    %cst = arith.constant dense<0.000000e+00> : vector<4x8x8xf32>
    %9 = tpu.matmul %6, %7, %cst {dimension_numbers = #tpu.dot_dimension_numbers<[2], [2], [1], [1], [0, 0, 0, 1, 1, 1], [0], [0]>} : vector<4x8x8xbf16>, vector<4x8x8xbf16>, vector<4x8x8xf32> -> vector<4x8x8xf32>
    "tpu.trace_stop"() : () -> ()
    %c0_8 = arith.constant 0 : index
    %c0_9 = arith.constant 0 : index
    %c0_10 = arith.constant 0 : index
    %10 = vector.load %arg3[%c0_8, %c0_9, %c0_10] : memref<1x1x8xf32, #tpu.memory_space<vmem>>, vector<1x1x8xf32>
    %11 = vector.shape_cast %10 : vector<1x1x8xf32> to vector<1x8xf32>
    %12 = vector.shape_cast %11 : vector<1x8xf32> to vector<1x1x8xf32>
    %13 = vector.broadcast %12 : vector<1x1x8xf32> to vector<4x8x8xf32>
    %14 = arith.addf %9, %13 : vector<4x8x8xf32>
    %cst_11 = arith.constant dense<0xFF800000> : vector<4x8xf32>
    %15 = vector.multi_reduction <maximumf>, %14, %cst_11 [2] : vector<4x8x8xf32> to vector<4x8xf32>
    %16 = vector.shape_cast %15 : vector<4x8xf32> to vector<4x8x1xf32>
    %17 = vector.broadcast %16 : vector<4x8x1xf32> to vector<4x8x8xf32>
    %18 = arith.subf %14, %17 : vector<4x8x8xf32>
    %19 = math.exp %18 : vector<4x8x8xf32>
    %cst_12 = arith.constant dense<0.000000e+00> : vector<4x8xf32>
    %20 = vector.multi_reduction <add>, %19, %cst_12 [2] : vector<4x8x8xf32> to vector<4x8xf32>
    %21 = vector.shape_cast %20 : vector<4x8xf32> to vector<4x8x1xf32>
    %22 = tpu.reciprocal %21 {approx = true} : vector<4x8x1xf32> -> vector<4x8x1xf32>
    %23 = vector.broadcast %22 : vector<4x8x1xf32> to vector<4x8x8xf32>
    %24 = arith.mulf %19, %23 : vector<4x8x8xf32>
    %25 = arith.truncf %24 : vector<4x8x8xf32> to vector<4x8x8xbf16>
    "tpu.trace_start"() <{level = 10 : i32, message = "nts,nsd->ntd"}> : () -> ()
    %cst_13 = arith.constant dense<0.000000e+00> : vector<4x8x8xf32>
    %26 = tpu.matmul %25, %8, %cst_13 {dimension_numbers = #tpu.dot_dimension_numbers<[2], [1], [1], [2], [0, 0, 0, 1, 1, 2], [0], [0]>} : vector<4x8x8xbf16>, vector<4x8x8xbf16>, vector<4x8x8xf32> -> vector<4x8x8xf32>
    "tpu.trace_stop"() : () -> ()
    %27 = tpu.transpose %26, [1, 0, 2] : vector<4x8x8xf32> -> vector<8x4x8xf32>
    %28 = vector.shape_cast %27 : vector<8x4x8xf32> to vector<8x32xf32>
    %29 = arith.truncf %28 : vector<8x32xf32> to vector<8x32xbf16>
    %c0_14 = arith.constant 0 : index
    %c0_15 = arith.constant 0 : index
    %30 = vector.load %arg6[%c0_14, %c0_15] : memref<32x32xbf16, #tpu.memory_space<vmem>>, vector<32x32xbf16>
    %cst_16 = arith.constant dense<0.000000e+00> : vector<8x32xf32>
    %31 = tpu.matmul %29, %30, %cst_16 {dimension_numbers = #tpu.dot_dimension_numbers<[1], [0], [0], [1], [0, 0, 1, 1], [], []>} : vector<8x32xbf16>, vector<32x32xbf16>, vector<8x32xf32> -> vector<8x32xf32>
    %c0_17 = arith.constant 0 : index
    %c0_18 = arith.constant 0 : index
    %32 = vector.load %arg7[%c0_17, %c0_18] : memref<1x32xf32, #tpu.memory_space<vmem>>, vector<1x32xf32>
    %33 = vector.broadcast %32 : vector<1x32xf32> to vector<8x32xf32>
    %34 = arith.addf %31, %33 : vector<8x32xf32>
    %c0_19 = arith.constant 0 : index
    %35 = arith.index_cast %4 : i32 to index
    %c0_20 = arith.constant 0 : index
    %36 = vector.load %arg2[%c0_19, %35, %c0_20] : memref<1x8x32xf32, #tpu.memory_space<vmem>>, vector<1x8x32xf32>
    %37 = vector.shape_cast %36 : vector<1x8x32xf32> to vector<8x32xf32>
    %38 = arith.addf %34, %37 : vector<8x32xf32>
    %cst_21 = arith.constant dense<0.000000e+00> : vector<8xf32>
    %39 = vector.multi_reduction <add>, %38, %cst_21 [1] : vector<8x32xf32> to vector<8xf32>
    %40 = vector.shape_cast %39 : vector<8xf32> to vector<8x1xf32>
    %cst_22 = arith.constant 3.200000e+01 : f32
    %41 = vector.broadcast %cst_22 : f32 to vector<8x1xf32>
    %42 = arith.divf %40, %41 : vector<8x1xf32>
    %43 = vector.broadcast %42 : vector<8x1xf32> to vector<8x32xf32>
    %44 = arith.subf %38, %43 : vector<8x32xf32>
    %45 = arith.mulf %44, %44 : vector<8x32xf32>
    %cst_23 = arith.constant dense<0.000000e+00> : vector<8xf32>
    %46 = vector.multi_reduction <add>, %45, %cst_23 [1] : vector<8x32xf32> to vector<8xf32>
    %47 = vector.shape_cast %46 : vector<8xf32> to vector<8x1xf32>
    %cst_24 = arith.constant 3.200000e+01 : f32
    %48 = vector.broadcast %cst_24 : f32 to vector<8x1xf32>
    %49 = arith.divf %47, %48 : vector<8x1xf32>
    %50 = vector.broadcast %42 : vector<8x1xf32> to vector<8x32xf32>
    %51 = arith.subf %38, %50 : vector<8x32xf32>
    %cst_25 = arith.constant 9.99999996E-13 : f32
    %52 = vector.broadcast %cst_25 : f32 to vector<8x1xf32>
    %53 = arith.addf %49, %52 : vector<8x1xf32>
    %54 = math.rsqrt %53 : vector<8x1xf32>
    %55 = vector.broadcast %54 : vector<8x1xf32> to vector<8x32xf32>
    %56 = arith.mulf %51, %55 : vector<8x32xf32>
    %c0_26 = arith.constant 0 : index
    %c0_27 = arith.constant 0 : index
    %57 = vector.load %arg8[%c0_26, %c0_27] : memref<1x32xf32, #tpu.memory_space<vmem>>, vector<1x32xf32>
    %58 = vector.broadcast %57 : vector<1x32xf32> to vector<8x32xf32>
    %59 = arith.mulf %56, %58 : vector<8x32xf32>
    %c0_28 = arith.constant 0 : index
    %c0_29 = arith.constant 0 : index
    %60 = vector.load %arg9[%c0_28, %c0_29] : memref<1x32xf32, #tpu.memory_space<vmem>>, vector<1x32xf32>
    %61 = vector.broadcast %60 : vector<1x32xf32> to vector<8x32xf32>
    %62 = arith.addf %59, %61 : vector<8x32xf32>
    %c0_30 = arith.constant 0 : index
    %c0_31 = arith.constant 0 : index
    %c0_32 = arith.constant 0 : index
    %63 = vector.load %arg10[%c0_30, %c0_31, %c0_32] : memref<1x8x32xf32, #tpu.memory_space<vmem>>, vector<1x8x32xf32>
    %64 = vector.shape_cast %63 : vector<1x8x32xf32> to vector<8x32xf32>
    %65 = vector.shape_cast %62 : vector<8x32xf32> to vector<1x8x32xf32>
    tpu.vector_store %arg10[%c0_30, %c0_31, %c0_32], %65 {strides = array<i32>} : memref<1x8x32xf32, #tpu.memory_space<vmem>>, vector<1x8x32xf32>,
    return
  }
  func.func @transform_0(%arg0: i32, %arg1: i32) -> (i32, i32, i32) {
    %c0_i32 = arith.constant 0 : i32
    %c0_i32_0 = arith.constant 0 : i32
    %c0_i32_1 = arith.constant 0 : i32
    return %arg0, %c0_i32, %c0_i32_0 : i32, i32, i32
  }
  func.func @transform_1(%arg0: i32, %arg1: i32) -> (i32, i32, i32) {
    %c0_i32 = arith.constant 0 : i32
    %c0_i32_0 = arith.constant 0 : i32
    %c0_i32_1 = arith.constant 0 : i32
    return %arg0, %c0_i32, %c0_i32_0 : i32, i32, i32
  }
  func.func @transform_2(%arg0: i32, %arg1: i32) -> (i32, i32) {
    %c0_i32 = arith.constant 0 : i32
    %c0_i32_0 = arith.constant 0 : i32
    %c0_i32_1 = arith.constant 0 : i32
    return %c0_i32, %c0_i32_0 : i32, i32
  }
  func.func @transform_3(%arg0: i32, %arg1: i32) -> (i32, i32) {
    %c0_i32 = arith.constant 0 : i32
    %c0_i32_0 = arith.constant 0 : i32
    %c0_i32_1 = arith.constant 0 : i32
    return %c0_i32, %c0_i32_0 : i32, i32
  }
  func.func @transform_4(%arg0: i32, %arg1: i32) -> (i32, i32) {
    %c0_i32 = arith.constant 0 : i32
    %c0_i32_0 = arith.constant 0 : i32
    %c0_i32_1 = arith.constant 0 : i32
    return %c0_i32, %c0_i32_0 : i32, i32
  }
  func.func @transform_5(%arg0: i32, %arg1: i32) -> (i32, i32) {
    %c0_i32 = arith.constant 0 : i32
    %c0_i32_0 = arith.constant 0 : i32
    %c0_i32_1 = arith.constant 0 : i32
    return %c0_i32, %c0_i32_0 : i32, i32
  }
  func.func @transform_6(%arg0: i32, %arg1: i32) -> (i32, i32) {
    %c0_i32 = arith.constant 0 : i32
    %c0_i32_0 = arith.constant 0 : i32
    %c0_i32_1 = arith.constant 0 : i32
    return %c0_i32, %c0_i32_0 : i32, i32
  }
  func.func @transform_7(%arg0: i32, %arg1: i32) -> (i32, i32) {
    %c0_i32 = arith.constant 0 : i32
    %c0_i32_0 = arith.constant 0 : i32
    %c0_i32_1 = arith.constant 0 : i32
    return %c0_i32, %c0_i32_0 : i32, i32
  }
  func.func @transform_8(%arg0: i32, %arg1: i32) -> (i32, i32, i32) {
    %c0_i32 = arith.constant 0 : i32
    %c0_i32_0 = arith.constant 0 : i32
    return %arg0, %arg1, %c0_i32 : i32, i32, i32
  }
}

</mosaic_0001>

<bundles_post_ra>
// kernel: tpu_custom_call.1
= control target key start
LH: loop header
LB: loop body
LE: loop exit
PB: predicated region body
PF: predicated region fallthrough
CT: control target
= control target key end

     0   :  { %s2765_s0 = inlined_call_operand.hbm [shape: f32[2,8,32], index: 0, kind: input, shape index: {}]   ;;  %s2766_s1 = inlined_call_operand.vmem [shape: f32[2,1,8], index: 1, kind: input, shape index: {}]   ;;  %s2767_s2 = inlined_call_operand.hbm [shape: bf16[32,96], index: 2, kind: input, shape index: {}]   ;;  %s2768_s3 = inlined_call_operand.vmem [shape: f32[1,96], index: 3, kind: input, shape index: {}]   ;;  %s2769_s4 = inlined_call_operand.hbm [shape: bf16[32,32], index: 4, kind: input, shape index: {}]   ;;  %s2770_s5 = inlined_call_operand.vmem [shape: f32[1,32], index: 5, kind: input, shape index: {}]   ;;  %s2771_s6 = inlined_call_operand.vmem [shape: f32[1,32], index: 6, kind: input, shape index: {}]   ;;  %s2772_s7 = inlined_call_operand.vmem [shape: f32[1,32], index: 7, kind: input, shape index: {}]   ;;  %s2773_s8 = inlined_call_operand.hbm [shape: f32[2,8,32], index: 8, kind: output, shape index: {}]  }
   0x1   :  { %2781 = sst [smem:[#allocation17_spill]] %s2773_s8 }
   0x2   :  { %13 = vsyncpa [#allocation6], 0 }
   0x3   :  { %15 = vsyncpa [#allocation6 + $0x1], 0 }
   0x4   :  { %16 = vsyncpa [#allocation9], 0 }
   0x5   :  { %17 = vsyncpa [#allocation7], 0 }
   0x6   :  { %19 = vsyncpa [#allocation7 + $0x1], 0  ;;  %s2300_s27 = smov 0   ;;  %s2302_s28 = smov 0  }
   0x7   :  { %s2304_s29 = smov 0   ;;  %s2306_s30 = smov 0  }
   0x8   :  { %s2308_s9 = smov 0   ;;  %s2310_s10 = smov 0  }
   0x9 LB: > { %2782 = sst [smem:[#allocation15_spill]] %s2214_s27  ;;  %s1818_s11 = sadd.s32 4294967295, %s2234_s10   ;;  %s2234_s10 = sphi %s2310_s10, %s25_s10   ;;  %s2230_s9 = sphi %s2308_s9, %s2804_s9   ;;  %s2226_s30 = sphi %s2306_s30, %s2803_s30   ;;  %s2222_s29 = sphi %s2304_s29, %s2802_s29   ;;  %s2218_s28 = sphi %s2302_s28, %s2801_s28   ;;  %s2214_s27 = sphi %s2300_s27, %s2800_s27  }
   0xa   : > { %s1819_s12 = sadd.s32 4294967294, %s2234_s10   ;;  %p57_p0 = scmp.ne.s32.totalorder %s2218_s28, %s2214_s27 }
   0xb   : > { %p2334_p1 = scmp.eq.s32.totalorder %s1818_s11, 0  ;;  %p2338_p2 = scmp.eq.s32.totalorder %s1818_s11, 1 }
   0xc   : > { %p241_p3 = scmp.eq.s32.totalorder %s1819_s12, 1  ;;  %p1820_p5 = scmp.ge.s32.totalorder %s2234_s10, 1 }
   0xd   : > { %s2783_s13 = scalar_select %p2334_p1, 1, 0 }
   0xe   : > { %p2344_p4 = por %p2334_p1, %p57_p0  ;;  %p2349_p6 = por %p241_p3, %p57_p0 }
   0xf   : > { %p248_p7 = scmp.lt.s32.totalorder %s2234_s10, 3  ;;  %s2236_s18 = smov [#allocation8]  }
  0x10   : > { %s2785_s15 = scalar_select %p2344_p4, 1, 0 }
  0x11   : > { %s2786_s16 = scalar_select %p2349_p6, 1, 0 }
  0x12   : > { %p2354_p8 = pnand %p1820_p5, %p248_p7  ;;  %s260_s19 = sshll.u32 %s2236_s18, 4  ;;  %s2358_s19 = int_to_ptr.vmem [resolvable:$true] %s260_s19 }
  0x13   : > { %2787 = sst [smem:[#allocation16_spill]] %s2786_s16  ;;  %s2237_s21 = smov [#allocation10]  }
  0x14   : > { %p1954_p9 = pneg %p2354_p8  ;;  %s276_s22 = sshll.u32 %s2237_s21, 4  ;;  %s2369_s22 = int_to_ptr.vmem [resolvable:$true] %s276_s22 }
  0x15   : > { %s2062_s25 = scalar_lea.hbm %s2767_s2, 256 }
  0x16   : > { %p2365_p11 = pnand %p1954_p9, %p2334_p1  ;;  %p2063_p12 = scmp.ne.s32.totalorder %s2767_s2, %s2062_s25 }
  0x17   : > { %p2069_p5 = scmp.lt.u32.totalorder %s2062_s25, %s2767_s2 }
  0x18   : > { %p2064_p13 = pneg %p2365_p11 }
  0x1a   : > { %p2065_p0 = pnand %p2064_p13, %p2063_p12 }
  0x1c   : > { %p2066_p3 = pneg %p2065_p0 }
  0x1e   : > { %p2071_p7 = pnand %p2069_p5, %p2066_p3 }
  0x20   : > { %2074 = shalt.err (!%p2071_p7)
}
  0x21   : > { %s2075_s21 = scalar_lea.vmem %s2358_s19, 256  ;;  %p2083_p1 = scmp.lt.s32.totalorder %s2358_s19, %s2358_s19 }
  0x22   : > { %p2076_p9 = scmp.ne.s32.totalorder %s2358_s19, %s2075_s21  ;;  %p2084_p12 = scmp.lt.s32.totalorder %s2075_s21, %s2075_s21 }
  0x24   : > { %p2078_p10 = pnand %p2076_p9, %p2064_p13  ;;  %p2085_p0 = por %p2084_p12, %p2083_p1 }
  0x26   : > { %p2079_p6 = pneg %p2078_p10 }
  0x28   : > { %p2086_p4 = pnand %p2085_p0, %p2079_p6 }
  0x2a   : > { %2089 = shalt.err (!%p2086_p4)
}
  0x2b   : > { %s2238_s23 = smov 64   ;;  %s2239_s24 = smov 4  }
  0x2c   : > { %1957 = dma.hbm_to_vmem [thread:$0]  (!%p2365_p11), %s2767_s2, 256, %s2358_s19, [#allocation9], %s2238_s23, %s2238_s23, %s2239_s24  }
  0x2d   : > { %s2090_s18 = scalar_lea.hbm %s2769_s4, 256 }
  0x2e   : > { %p2091_p1 = scmp.ne.s32.totalorder %s2769_s4, %s2090_s18  ;;  %p2097_p10 = scmp.lt.u32.totalorder %s2090_s18, %s2769_s4 }
  0x30   : > { %p2093_p4 = pnand %p2091_p1, %p2064_p13 }
  0x32   : > { %p2094_p6 = pneg %p2093_p4 }
  0x34   : > { %p2099_p3 = pnand %p2097_p10, %p2094_p6 }
  0x36   : > { %2102 = shalt.err (!%p2099_p3)
}
  0x37   : > { %s2103_s19 = scalar_lea.vmem %s2369_s22, 256  ;;  %p2111_p12 = scmp.lt.s32.totalorder %s2369_s22, %s2369_s22 }
  0x38   : > { %p2104_p5 = scmp.ne.s32.totalorder %s2369_s22, %s2103_s19  ;;  %p2112_p0 = scmp.lt.s32.totalorder %s2103_s19, %s2103_s19 }
  0x3a   : > { %p2106_p7 = pnand %p2104_p5, %p2064_p13  ;;  %p2113_p1 = por %p2112_p0, %p2111_p12 }
  0x3c   : > { %p2107_p9 = pneg %p2106_p7 }
  0x3e   : > { %p2114_p4 = pnand %p2113_p1, %p2107_p9 }
  0x40   : > { %2117 = shalt.err (!%p2114_p4)
}
  0x41   : > { %1960 = dma.hbm_to_vmem [thread:$0]  (!%p2365_p11), %s2769_s4, 256, %s2369_s22, [#allocation9], %s2238_s23, %s2238_s23, %s2239_s24  }
  0x42   : > { %s37_s16 = sadd.s32 1, %s2230_s9  ;;  %s44_s25 = sadd.s32 1, %s2222_s29 }
  0x43   : > { %p39_p13 = scmp.ge.s32.totalorder %s37_s16, 2  ;;  %p51_p6 = scmp.ne.s32.totalorder %s2222_s29, %s2218_s28 }
  0x44   : > { %p52_p10 = scmp.eq.s32.totalorder %s2234_s10, 0  ;;  %p1971_p3 = scmp.lt.s32.totalorder %s2234_s10, 2 }
  0x45   : > { %s2806_s16 = smov (%p39_p13, %s37_s16), 0  ;;  %p2433_p7 = por %p2338_p2, %p51_p6 }
  0x46   : > { %p53_p5 = por %p52_p10, %p51_p6  ;;  %s41_s26 = ssub.s32 %s2230_s9, %s2806_s16 }
  0x47   : > { %s2790_s20 = scalar_select %p2433_p7, 1, 0 }
  0x48   : > { %s299_s11 = sand.u32 1, %s2222_s29   ;;  %p42_p9 = scmp.eq.s32.totalorder %s41_s26, 0 }
  0x49   : > { %s1824_s22 = sshll.u32 %s299_s11, 3  ;;  %s1825_s23 = sshll.u32 %s2230_s9, 7 }
  0x4a   : > { %s2442_s24 = scalar_select %p42_p9, %s2222_s29, %s44_s25  }
  0x4b   : > { %s2447_s21 = scalar_lea.hbm %s2765_s0, %s1825_s23  ;;  %s303_s14 = scalar_lea.vmem [#allocation5], %s1824_s22 }
  0x4c   : > { %s310_s19 = sshll.u32 %s303_s14, 4  ;;  %p2451_p2 = pnand %p1971_p3, %p53_p5  ;;  %s2455_s19 = int_to_ptr.vmem [resolvable:$true] %s310_s19 }
  0x4d   : > { %s300_s27 = scalar_lea.sflag [#allocation6], %s299_s11  ;;  %s2118_s25 = scalar_lea.hbm %s2447_s21, 128 }
  0x4e   : > { %p2119_p11 = scmp.ne.s32.totalorder %s2447_s21, %s2118_s25  ;;  %p2120_p12 = pneg %p2451_p2 }
  0x4f   : > { %s2123_s23 = scalar_lea.hbm %s2765_s0, 256  ;;  %p2124_p4 = scmp.lt.u32.totalorder %s2447_s21, %s2765_s0 }
  0x50   : > { %p2121_p0 = pnand %p2120_p12, %p2119_p11  ;;  %p2125_p13 = scmp.lt.u32.totalorder %s2123_s23, %s2118_s25 }
  0x51   : > { %p2127_p10 = scmp.lt.u32.totalorder %s2118_s25, %s2447_s21 }
  0x52   : > { %p2122_p1 = pneg %p2121_p0  ;;  %p2126_p6 = por %p2125_p13, %p2124_p4 }
  0x54   : > { %p2128_p3 = por %p2127_p10, %p2126_p6 }
  0x56   : > { %p2129_p5 = pnand %p2128_p3, %p2122_p1 }
  0x58   : > { %2132 = shalt.err (!%p2129_p5)
}
  0x59   : > { %s2133_s11 = scalar_lea.vmem %s2455_s19, 128  ;;  %s2240_s14 = smov [#allocation5]  }
  0x5a   : > { %p2134_p9 = scmp.ne.s32.totalorder %s2455_s19, %s2133_s11  ;;  %s2138_s26 = sshll.u32 %s2240_s14, 4  ;;  %s2139_s26 = int_to_ptr.vmem [resolvable:$false] %s2138_s26 }
  0x5b   : > { %s2140_s22 = scalar_lea.vmem %s2139_s26, 256  ;;  %p2141_p7 = scmp.lt.s32.totalorder %s2455_s19, %s2139_s26 }
  0x5c   : > { %p2136_p11 = pnand %p2134_p9, %p2120_p12  ;;  %p2142_p4 = scmp.lt.s32.totalorder %s2140_s22, %s2133_s11 }
  0x5e   : > { %p2137_p0 = pneg %p2136_p11  ;;  %p2143_p13 = por %p2142_p4, %p2141_p7 }
  0x60   : > { %p2144_p6 = pnand %p2143_p13, %p2137_p0 }
  0x62   : > { %2147 = shalt.err (!%p2144_p6)
}
  0x63   : > { %1964 = dma.hbm_to_vmem [thread:$0]  (!%p2451_p2), %s2447_s21, 128, %s2455_s19, %s300_s27  }
  0x64   : > { %325 = sbr.rel (%p2354_p8) target bundleno = 2051 (0x803), region = 52  ;;  %s2485_s25 = sand.u32 (!%p2354_p8), 1, %s2218_s28  }
  0x65   : > { %s1827_s23 = sshll.u32 (!%p2354_p8), %s2485_s25, 3  ;;  %s328_s12 = scalar_lea.sflag (!%p2354_p8), [#allocation6], %s2485_s25 }
  0x66   : > { %s331_s18 = scalar_lea.vmem (!%p2354_p8), [#allocation5], %s1827_s23  ;;  %p2792_p7 = scmp.ne.s32.totalorder (!%p2354_p8), %s2785_s15, 0 }
  0x6b   : > { %2201 = dma.done.wait (%p2792_p7), %s328_s12, 128  }
  0x6c   : > { %2203 = vsyncadd (%p2792_p7), %s328_s12, 4294967168  ;;  %p2793_p2 = scmp.ne.s32.totalorder %s2783_s13, 0 }
  0x6e   : > { %2205 = dma.done.wait (%p2793_p2), [#allocation9], 512  }
  0x6f   : > { %2207 = vsyncadd (%p2793_p2), [#allocation9], 4294966784  ;;  %v2241_v0 = vmov 0.0   ;;  %vm2242_vm0 = vmmov 0   ;;  %v2040_v1 = vld [vmem:[#allocation8] sm:$0xff]   ;;  %v2041_v2 = vld [vmem:[#allocation8 + $0x8] sm:$0xff]   ;;  %v464_v19 = vlaneseq }
  0x70   : > { %1878 = vmatprep.subr.bf16.mxu0 %v2241_v0  ;;  %1882 = vmatprep.mubr.msk.bf16.mxu0 %vm2242_vm0, %v2241_v0  ;;  %v2505_v3 = vld [vmem:[%s331_s18] sm:$0xff]  ;;  %vm408_vm1 = vcmask 261120   ;;  %v1831_v5 = vld [vmem:[%s2768_s3] ss:$0 sm:$0xff]  ;;  %s2243_s17 = smov 104   ;;  %s2244_s21 = smov 120  }
  0x71   : > { %1886 = vmatprep.subr.bf16.mxu1 %v2241_v0  ;;  %1888 = vmatprep.mubr.msk.bf16.mxu1 %vm2242_vm0, %v2241_v0  ;;  %v384_v4 = vpack.c.bf16 %v2505_v3, %v2505_v3  ;;  %s2245_s19 = smov 96   ;;  %s2246_s8 = smov 112   ;;  %v2247_v17 = vmov 1983009808   ;;  %v2248_v20 = vmov 1934713408  }
  0x72   : > { %1879 = vmatpush3.bf16.msra.mxu0 %v2040_v1  ;;  %v462_v18 = vunpack.c.l.s4 %v2247_v17  ;;  %v479_v21 = vunpack.c.l.s4 %v2248_v20  ;;  %v465_v23 = vshrl.u32 %v464_v19, 7  ;;  %v2249_v48 = vmov 0   ;;  %p375_p8 = scmp.lt.s32.totalorder %s2226_s30, 1  ;;  %s2250_s22 = smov 64  }
  0x73   : > { %1880 = vmatprep.subr.bf16.mxu0 %v2241_v0  ;;  %vm626_vm2 = vcmask 60416   ;;  %vm1019_vm3 = vcmask 64512   ;;  %vm1255_vm4 = vcmask 1043456   ;;  %s2251_s12 = smov 16   ;;  %s2252_s18 = smov 8   ;;  %vm1586_vm5 = vcmask 130048  }
  0x74   : > { %v463_v22 = vunpack.c.0.s8 %v462_v18  ;;  %v480_v26 = vunpack.c.0.s8 %v479_v21  ;;  %s376_s27 = scalar_select %p375_p8, %s2226_s30, 1  ;;  %vm1588_vm6 = vcmask 195584  }
  0x75   : > { %s2253_s13 = smov 24   ;;  %s1853_s11 = sshll.u32 %s2226_s30, 7 }
  0x76   : > { %1881 = vmatpush3.bf16.msra.mxu0 %v2041_v2  ;;  %v2532_v27 = vsub.s32 %v463_v22, %v465_v23  ;;  %v2534_v28 = vsub.s32 %v480_v26, %v465_v23  ;;  %s377_s26 = scalar_lea.vmem %s2766_s1, %s376_s27  ;;  %s374_s14 = scalar_lea.vmem [#allocation11], %s1827_s23 }
  0x77   : > { %1892 = vmatprep.subr.bf16.mxu0 %v2241_v0  ;;  %s1693_s15 = scalar_lea.sflag [#allocation7], %s2485_s25  ;;  %p2795_p1 = scmp.ne.s32.totalorder %s2790_s20, 0 }
  0x78   : > { %s2254_s30 = smov [#allocation11]  }
  0x79   : > { %1883 = vmatmul.mubr.msk.bf16.vlgmr.msra.gmra.mrb[0].mxu0 %vm408_vm1, %v384_v4  ;;  %s2152_s23 = sshll.u32 %s2254_s30, 4  ;;  %s2153_s23 = int_to_ptr.vmem [resolvable:$false] %s2152_s23 }
  0x7a   : > { %1894 = vmatprep.mubr.msk.bf16.mxu0 %vm2242_vm0, %v2241_v0 }
 0x14c   : > { %v446_v6 = vpop.f32.mrb[0].mxu0 }
 0x14d   : > { %v447_v7 = vadd.f32 %v1831_v5, %v446_v6  ;;  %v1884_v8 = vpop.f32.mrb[1].mxu0 }
 0x14e   : > { %v449_v9 = vpop.f32.mrb[2].mxu0 }
 0x14f   : > { %v2517_v10 = vpack.c.bf16 %v447_v7, %v447_v7  ;;  %v1885_v11 = vpop.f32.mrb[3].mxu0  ;;  %v452_v13 = vmul.f32 0.35355338, %v447_v7 }
 0x151   : > { %637 = vrot.lane.b32.xlu1 %v2517_v10, %s2243_s17  ;;  %633 = vrot.lane.b32.xlu0 %v2517_v10, %s2244_s21  ;;  %v453_v16 = vpack.c.bf16 %v452_v13, %v452_v13 }
 0x153   : > { %v467_v45 = vrot.slane %v453_v16, %v2532_v27 }
 0x155   : > { %639 = vrot.lane.b32.xlu1 %v2517_v10, %s2245_s19  ;;  %635 = vrot.lane.b32.xlu0 %v2517_v10, %s2246_s8 }
 0x1c3   : > { %v2523_v12 = vpop.permute.xlu0 %633  ;;  %v2526_v14 = vpop.permute.xlu1 %637 }
 0x1c4   : > { %641 = vrot.lane.b32.xlu0 %v2523_v12, %s2245_s19 }
 0x1c7   : > { %v2528_v15 = vpop.permute.xlu0 %635  ;;  %v640_v24 = vpop.permute.xlu1 %639 }
 0x1c8   : > { %645 = vrot.lane.b32.xlu0 %v2526_v14, %s2245_s19  ;;  %643 = vrot.lane.b32.xlu1 %v2528_v15, %s2245_s19  ;;  %v654_v31 = vrot.slane %v640_v24, %v2532_v27 }
 0x1cc   : > { %457 = vrot.lane.b32.xlu0 %v453_v16, %s2246_s8  ;;  %455 = vrot.lane.b32.xlu1 %v453_v16, %s2244_s21  ;;  %s2154_s21 = scalar_lea.vmem %s2153_s23, 256 }
 0x1d0   : > { %459 = vrot.lane.b32.xlu1 %v453_v16, %s2243_s17 }
 0x236   : > { %v642_v25 = vpop.permute.xlu0 %641 }
 0x237   : > { %v688_v32 = vrot.slane %v642_v25, %v2532_v27 }
 0x23a   : > { %v644_v29 = vpop.permute.xlu1 %643  ;;  %v646_v30 = vpop.permute.xlu0 %645 }
 0x23b   : > { %v662_v33 = vrot.slane %v644_v29, %v2532_v27  ;;  %v696_v34 = vrot.slane %v646_v30, %v2532_v27 }
 0x23d   : > { %v663_v35 = vcombine.low %v654_v31, %v662_v33  ;;  %v664_v36 = vcombine.high %v654_v31, %v662_v33  ;;  %v697_v37 = vcombine.low %v688_v32, %v696_v34  ;;  %v698_v38 = vcombine.high %v688_v32, %v696_v34 }
 0x23e   : > { %v458_v39 = vpop.permute.xlu0 %457  ;;  %v456_v40 = vpop.permute.xlu1 %455 }
 0x23f   : > { %v671_v41 = vrot.slane %v663_v35, %v2534_v28  ;;  %v678_v42 = vrot.slane %v664_v36, %v2534_v28  ;;  %v705_v43 = vrot.slane %v697_v37, %v2534_v28  ;;  %v712_v44 = vrot.slane %v698_v38, %v2534_v28 }
 0x240   : > { %v475_v46 = vrot.slane %v458_v39, %v2532_v27  ;;  %v501_v47 = vrot.slane %v456_v40, %v2532_v27 }
 0x241   : > { %v679_v49 = vcombine.high %v671_v41, %v2249_v48  ;;  %v680_v50 = vcombine.high %v678_v42, %v2249_v48  ;;  %v719_v51 = vshrl.u32 %v671_v41, 16  ;;  %v735_v52 = vshrl.u32 %v678_v42, 16 }
 0x242   : > { %v713_v53 = vcombine.high %v705_v43, %v2249_v48  ;;  %v714_v54 = vcombine.high %v712_v44, %v2249_v48  ;;  %v717_v55 = vpack.i.b16 %v705_v43, %v671_v41  ;;  %v720_v56 = vshrl.u32 %v705_v43, 16  ;;  %v460_v61 = vpop.permute.xlu1 %459 }
 0x243   : > { %v727_v57 = vshrl.u32 %v679_v49, 16  ;;  %v743_v58 = vshrl.u32 %v680_v50, 16  ;;  %v733_v59 = vpack.i.b16 %v712_v44, %v678_v42  ;;  %v736_v60 = vshrl.u32 %v712_v44, 16 }
 0x244   : > { %v721_v62 = vpack.i.b16 %v720_v56, %v719_v51  ;;  %v725_v63 = vpack.i.b16 %v713_v53, %v679_v49  ;;  %v728_v1 = vshrl.u32 %v713_v53, 16  ;;  %v741_v2 = vpack.i.b16 %v714_v54, %v680_v50 }
 0x245   : > { %v737_v4 = vpack.i.b16 %v736_v60, %v735_v52  ;;  %v744_v5 = vshrl.u32 %v714_v54, 16  ;;  %v747_v6 = vcombine.low %v717_v55, %v733_v59  ;;  %v476_v7 = vcombine.low %v467_v45, %v475_v46 }
 0x246   : > { %v729_v8 = vpack.i.b16 %v728_v1, %v727_v57  ;;  %v755_v9 = vcombine.low %v725_v63, %v741_v2  ;;  %v477_v11 = vcombine.high %v467_v45, %v475_v46  ;;  %v509_v13 = vrot.slane %v460_v61, %v2532_v27 }
 0x247   : > { %v745_v16 = vpack.i.b16 %v744_v5, %v743_v58  ;;  %v754_v17 = vrot.slane %v747_v6, %v2532_v27  ;;  %v772_v18 = vcombine.low %v721_v62, %v737_v4  ;;  %v484_v19 = vrot.slane %v476_v7, %v2534_v28 }
 0x248   : > { %v762_v20 = vrot.slane %v755_v9, %v2532_v27  ;;  %v491_v21 = vrot.slane %v477_v11, %v2534_v28  ;;  %v510_v22 = vcombine.low %v501_v47, %v509_v13  ;;  %v511_v23 = vcombine.high %v501_v47, %v509_v13 }
 0x249   : > { %v780_v24 = vcombine.low %v729_v8, %v745_v16  ;;  %v492_v25 = vcombine.high %v484_v19, %v2249_v48  ;;  %v779_v29 = vrot.slane %v772_v18, %v2532_v27  ;;  %v532_v33 = vshrl.u32 %v484_v19, 16 }
 0x24a   : > { %v763_v26 = vcombine.low %v754_v17, %v762_v20  ;;  %v493_v30 = vcombine.high %v491_v21, %v2249_v48  ;;  %v518_v31 = vrot.slane %v510_v22, %v2534_v28  ;;  %v548_v34 = vshrl.u32 %v491_v21, 16 }
 0x24b   : > { %v787_v32 = vrot.slane %v780_v24, %v2532_v27  ;;  %v525_v35 = vrot.slane %v511_v23, %v2534_v28  ;;  %v540_v37 = vshrl.u32 %v492_v25, 16 }
 0x24c   : > { %v770_v36 = vrot.slane %v763_v26, %v2534_v28  ;;  %v526_v38 = vcombine.high %v518_v31, %v2249_v48  ;;  %v530_v39 = vpack.i.b16 %v518_v31, %v484_v19  ;;  %v533_v42 = vshrl.u32 %v518_v31, 16 }
 0x24d   : > { %v788_v40 = vcombine.low %v779_v29, %v787_v32  ;;  %v527_v41 = vcombine.high %v525_v35, %v2249_v48  ;;  %v546_v43 = vpack.i.b16 %v525_v35, %v491_v21  ;;  %v556_v45 = vshrl.u32 %v493_v30, 16 }
 0x24e   : > { %v771_v44 = vcombine.high %v770_v36, %v2249_v48  ;;  %v538_v46 = vpack.i.b16 %v526_v38, %v492_v25  ;;  %v541_v47 = vshrl.u32 %v526_v38, 16  ;;  %v534_v50 = vpack.i.b16 %v533_v42, %v532_v33 }
 0x24f   : > { %v795_v49 = vrot.slane %v788_v40, %v2534_v28  ;;  %v549_v51 = vshrl.u32 %v525_v35, 16  ;;  %v554_v52 = vpack.i.b16 %v527_v41, %v493_v30  ;;  %v801_v53 = vshrl.u32 %v770_v36, 16 }
 0x250   : > { %v542_v54 = vpack.i.b16 %v541_v47, %v540_v37  ;;  %v557_v55 = vshrl.u32 %v527_v41, 16  ;;  %v560_v56 = vcombine.low %v530_v39, %v546_v43  ;;  %v809_v61 = vshrl.u32 %v771_v44, 16 }
 0x251   : > { %v796_v57 = vcombine.high %v795_v49, %v2249_v48  ;;  %v799_v58 = vpack.i.b16 %v795_v49, %v770_v36  ;;  %v802_v59 = vshrl.u32 %v795_v49, 16  ;;  %v550_v60 = vpack.i.b16 %v549_v51, %v548_v34 }
 0x252   : > { %v558_v62 = vpack.i.b16 %v557_v55, %v556_v45  ;;  %v568_v63 = vcombine.low %v538_v46, %v554_v52  ;;  %v567_v6 = vrot.slane %v560_v56, %v2532_v27 }
 0x253   : > { %v803_v1 = vpack.i.b16 %v802_v59, %v801_v53  ;;  %v807_v2 = vpack.i.b16 %v796_v57, %v771_v44  ;;  %v810_v4 = vshrl.u32 %v796_v57, 16  ;;  %813 = vst.msk [vmem:[#allocation3] sm:$0xf] %vm626_vm2, %v799_v58  ;;  %v585_v5 = vcombine.low %v534_v50, %v550_v60  ;;  %v1835_v44 = vld [vmem:[%s377_s26] ss:$0 sm:$0xff]  ;;  %s1707_s26 = sshll.u32 %s374_s14, 4  ;;  %s2717_s26 = int_to_ptr.vmem [resolvable:$true] %s1707_s26 }
 0x254   : > { %v575_v7 = vrot.slane %v568_v63, %v2532_v27  ;;  %v593_v8 = vcombine.low %v542_v54, %v558_v62  ;;  %s2148_s17 = scalar_lea.vmem %s2717_s26, 128  ;;  %p2155_p5 = scmp.lt.s32.totalorder %s2717_s26, %s2153_s23 }
 0x255   : > { %v811_v9 = vpack.i.b16 %v810_v4, %v809_v61  ;;  %814 = vst.msk [vmem:[#allocation3 + $0x4] sm:$0xf] %vm626_vm2, %v803_v1  ;;  %815 = vst.msk [vmem:[#allocation3 + $0x8] sm:$0xf] %vm626_vm2, %v807_v2  ;;  %v592_v13 = vrot.slane %v585_v5, %v2532_v27  ;;  %p2149_p12 = scmp.ne.s32.totalorder %s2717_s26, %s2148_s17  ;;  %p2156_p9 = scmp.lt.s32.totalorder %s2154_s21, %s2148_s17 }
 0x256   : > { %v576_v11 = vcombine.low %v567_v6, %v575_v7  ;;  %v600_v16 = vrot.slane %v593_v8, %v2532_v27 }
 0x257   : > { %816 = vst.msk [vmem:[#allocation3 + $0xc] sm:$0xf] %vm626_vm2, %v811_v9  ;;  %p2150_p10 = pnand %p2149_p12, %p2795_p1  ;;  %p2157_p11 = por %p2156_p9, %p2155_p5 }
 0x258   : > { %v583_v17 = vrot.slane %v576_v11, %v2534_v28  ;;  %v601_v18 = vcombine.low %v592_v13, %v600_v16 }
 0x259   : > { %p2151_p3 = pneg %p2150_p10 }
 0x25a   : > { %v584_v19 = vcombine.high %v583_v17, %v2249_v48  ;;  %v608_v20 = vrot.slane %v601_v18, %v2534_v28  ;;  %v1004_v21 = vld [vmem:[#allocation3] sm:$0xf]  ;;  %v614_v25 = vshrl.u32 %v583_v17, 16 }
 0x25b   : > { %v1024_v22 = vsel %vm1019_vm3, %v1004_v21, 0  ;;  %p2158_p0 = pnand %p2157_p11, %p2151_p3 }
 0x25c   : > { %v609_v23 = vcombine.high %v608_v20, %v2249_v48  ;;  %v612_v24 = vpack.i.b16 %v608_v20, %v583_v17  ;;  %v615_v26 = vshrl.u32 %v608_v20, 16  ;;  %1887 = vmatpush3.bf16.xpose.msra.mxu1 %v1024_v22  ;;  %v1005_v29 = vld [vmem:[#allocation3 + $0x4] sm:$0xf]  ;;  %v622_v33 = vshrl.u32 %v584_v19, 16  ;;  %v1006_v36 = vld [vmem:[#allocation3 + $0x8] sm:$0xf] }
 0x25d   : > { %v1070_v30 = vsel %vm1019_vm3, %v1005_v29, 0  ;;  %1898 = vmatprep.subr.bf16.mxu1 %v2241_v0  ;;  %v1116_v39 = vsel %vm1019_vm3, %v1006_v36, 0 }
 0x25e   : > { %v616_v31 = vpack.i.b16 %v615_v26, %v614_v25  ;;  %v620_v32 = vpack.i.b16 %v609_v23, %v584_v19  ;;  %v623_v34 = vshrl.u32 %v609_v23, 16  ;;  %627 = vst.msk [vmem:[#allocation2] sm:$0xf] %vm626_vm2, %v612_v24  ;;  %1893 = vmatpush3.bf16.xpose.msra.mxu0 %v1070_v30  ;;  %v1007_v38 = vld [vmem:[#allocation3 + $0xc] sm:$0xf] }
 0x25f   : > { %1904 = vmatprep.subr.bf16.mxu0 %v2241_v0  ;;  %v1162_v41 = vsel %vm1019_vm3, %v1007_v38, 0 }
 0x260   : > { %v624_v35 = vpack.i.b16 %v623_v34, %v622_v33  ;;  %628 = vst.msk [vmem:[#allocation2 + $0x4] sm:$0xf] %vm626_vm2, %v616_v31  ;;  %629 = vst.msk [vmem:[#allocation2 + $0x8] sm:$0xf] %vm626_vm2, %v620_v32 }
 0x262   : > { %630 = vst.msk [vmem:[#allocation2 + $0xc] sm:$0xf] %vm626_vm2, %v624_v35 }
 0x265   : > { %v1000_v37 = vld [vmem:[#allocation2] sm:$0xf] }
 0x266   : > { %1889 = vmatmul.mubr.msk.bf16.vlgmr.msra.gmra.mrb[0].mxu1 %vm1019_vm3, %v1000_v37 }
 0x267   : > { %1899 = vmatpush3.bf16.xpose.msra.mxu1 %v1116_v39  ;;  %v1001_v40 = vld [vmem:[#allocation2 + $0x4] sm:$0xf]  ;;  %1900 = vmatprep.mubr.msk.bf16.mxu1 %vm2242_vm0, %v2241_v0  ;;  %v1002_v42 = vld [vmem:[#allocation2 + $0x8] sm:$0xf] }
 0x268   : > { %1895 = vmatmul.mubr.msk.bf16.vlgmr.msra.gmra.mrb[4].mxu0 %vm1019_vm3, %v1001_v40  ;;  %1910 = vmatprep.subr.bf16.mxu1 %v2241_v0 }
 0x269   : > { %1905 = vmatpush3.bf16.xpose.msra.mxu0 %v1162_v41  ;;  %1906 = vmatprep.mubr.msk.bf16.mxu0 %vm2242_vm0, %v2241_v0  ;;  %v1003_v43 = vld [vmem:[#allocation2 + $0xc] sm:$0xf] }
 0x26a   : > { %1916 = vmatprep.subr.bf16.mxu0 %v2241_v0 }
 0x26e   : > { %1901 = vmatmul.mubr.msk.bf16.vlgmr.msra.gmra.mrb[4].mxu1 %vm1019_vm3, %v1002_v42 }
 0x26f   : > { %1912 = vmatprep.mubr.msk.bf16.mxu1 %vm2242_vm0, %v2241_v0 }
 0x270   : > { %1907 = vmatmul.mubr.msk.bf16.vlgmr.msra.gmra.mrb[8].mxu0 %vm1019_vm3, %v1003_v43 }
 0x271   : > { %1918 = vmatprep.mubr.msk.bf16.mxu0 %vm2242_vm0, %v2241_v0 }
 0x339   : > { %v1060_v45 = vpop.f32.mrb[0].mxu1 }
 0x33a   : > { %v1061_v46 = vadd.f32 %v1835_v44, %v1060_v45  ;;  %v1890_v47 = vpop.f32.mrb[1].mxu1 }
 0x33b   : > { %v1063_v49 = vpop.f32.mrb[2].mxu1  ;;  %v1106_v50 = vpop.f32.mrb[4].mxu0 }
 0x33c   : > { %v1107_v51 = vadd.f32 %v1835_v44, %v1106_v50  ;;  %v1891_v52 = vpop.f32.mrb[3].mxu1  ;;  %v1896_v53 = vpop.f32.mrb[5].mxu0  ;;  %v1204_v54 = vsel %vm1019_vm3, %v1061_v46, -inf }
 0x33d   : > { %1205 = vmax.xlane.f32.xlu0 %v1204_v54  ;;  %v1109_v55 = vpop.f32.mrb[6].mxu0 }
 0x33e   : > { %v1897_v56 = vpop.f32.mrb[7].mxu0  ;;  %v1207_v57 = vsel %vm1019_vm3, %v1107_v51, -inf }
 0x33f   : > { %1208 = vmax.xlane.f32.xlu1 %v1207_v57 }
 0x341   : > { %v1152_v58 = vpop.f32.mrb[4].mxu1 }
 0x342   : > { %v1153_v59 = vadd.f32 %v1835_v44, %v1152_v58  ;;  %v1902_v60 = vpop.f32.mrb[5].mxu1 }
 0x343   : > { %v1155_v61 = vpop.f32.mrb[6].mxu1  ;;  %v1198_v62 = vpop.f32.mrb[8].mxu0 }
 0x344   : > { %v1199_v63 = vadd.f32 %v1835_v44, %v1198_v62  ;;  %v1903_v1 = vpop.f32.mrb[7].mxu1  ;;  %v1908_v2 = vpop.f32.mrb[9].mxu0  ;;  %v1210_v4 = vsel %vm1019_vm3, %v1153_v59, -inf }
 0x345   : > { %1211 = vmax.xlane.f32.xlu0 %v1210_v4  ;;  %v1201_v5 = vpop.f32.mrb[10].mxu0 }
 0x346   : > { %v1909_v6 = vpop.f32.mrb[11].mxu0  ;;  %v1213_v7 = vsel %vm1019_vm3, %v1199_v63, -inf }
 0x349   : > { %1214 = vmax.xlane.f32.xlu0 %v1213_v7 }
 0x350   : > { %817 = vrot.lane.b32.xlu1 %v2517_v10, %s2250_s22 }
 0x354   : > { %821 = vrot.lane.b32.xlu1 %v2528_v15, %s2250_s22 }
 0x358   : > { %823 = vrot.lane.b32.xlu1 %v2526_v14, %s2250_s22 }
 0x35f   : > { %819 = vrot.lane.b32.xlu0 %v2523_v12, %s2250_s22 }
 0x3ca   : > { %v1206_v8 = vpop.xlane.xlu0 %1205 }
 0x3cb   : > { %v1216_v9 = vsub.f32 %v1061_v46, %v1206_v8 }
 0x3cc   : > { %v1209_v11 = vpop.xlane.xlu1 %1208 }
 0x3cd   : > { %v1220_v13 = vmul.f32 1.442695, %v1216_v9  ;;  %v1217_v16 = vsub.f32 %v1107_v51, %v1209_v11 }
 0x3cf   : > { %2044 = vpow2.f32 %v1220_v13  ;;  %v1222_v17 = vmul.f32 1.442695, %v1217_v16 }
 0x3d0   : > { %v818_v18 = vpop.permute.xlu1 %817 }
 0x3d1   : > { %2046 = vpow2.f32 %v1222_v17  ;;  %v832_v10 = vrot.slane %v818_v18, %v2532_v27 }
 0x3d2   : > { %v1212_v19 = vpop.xlane.xlu0 %1211 }
 0x3d3   : > { %v1218_v20 = vsub.f32 %v1153_v59, %v1212_v19 }
 0x3d4   : > { %v822_v21 = vpop.permute.xlu1 %821 }
 0x3d5   : > { %v1224_v22 = vmul.f32 1.442695, %v1218_v20  ;;  %v840_v15 = vrot.slane %v822_v21, %v2532_v27 }
 0x3d6   : > { %v1215_v14 = vpop.xlane.xlu0 %1214 }
 0x3d7   : > { %2048 = vpow2.f32 %v1224_v22  ;;  %v841_v12 = vcombine.low %v832_v10, %v840_v15  ;;  %v1219_v23 = vsub.f32 %v1199_v63, %v1215_v14  ;;  %v842_v25 = vcombine.high %v832_v10, %v840_v15 }
 0x3d8   : > { %v824_v29 = vpop.permute.xlu1 %823 }
 0x3d9   : > { %v2619_v24 = vpop.eup %2044  ;;  %v1226_v26 = vmul.f32 1.442695, %v1219_v23  ;;  %v849_v33 = vrot.slane %v841_v12, %v2534_v28  ;;  %v874_v34 = vrot.slane %v824_v29, %v2532_v27  ;;  %v856_v37 = vrot.slane %v842_v25, %v2534_v28 }
 0x3da   : > { %v820_v30 = vpop.permute.xlu0 %819  ;;  %v1228_v31 = vsel %vm1019_vm3, %v2619_v24, 0.0 }
 0x3db   : > { %v2623_v32 = vpop.eup %2046  ;;  %1229 = vadd.xlane.f32.xlu0 %v1228_v31  ;;  %2050 = vpow2.f32 %v1226_v26  ;;  %v866_v35 = vrot.slane %v820_v30, %v2532_v27  ;;  %v857_v40 = vcombine.high %v849_v33, %v2249_v48  ;;  %v858_v44 = vcombine.high %v856_v37, %v2249_v48 }
 0x3dc   : > { %v1231_v36 = vsel %vm1019_vm3, %v2623_v32, 0.0  ;;  %v897_v45 = vshrl.u32 %v849_v33, 16  ;;  %v913_v46 = vshrl.u32 %v856_v37, 16 }
 0x3dd   : > { %1232 = vadd.xlane.f32.xlu1 %v1231_v36  ;;  %v875_v38 = vcombine.low %v866_v35, %v874_v34  ;;  %v876_v39 = vcombine.high %v866_v35, %v874_v34  ;;  %v905_v52 = vshrl.u32 %v857_v40, 16  ;;  %v921_v60 = vshrl.u32 %v858_v44, 16 }
 0x3df   : > { %v883_v41 = vrot.slane %v875_v38, %v2534_v28  ;;  %v890_v42 = vrot.slane %v876_v39, %v2534_v28 }
 0x3e1   : > { %v2634_v43 = vpop.eup %2048  ;;  %v891_v47 = vcombine.high %v883_v41, %v2249_v48  ;;  %v892_v49 = vcombine.high %v890_v42, %v2249_v48  ;;  %v895_v50 = vpack.i.b16 %v883_v41, %v849_v33  ;;  %v898_v51 = vshrl.u32 %v883_v41, 16 }
 0x3e2   : > { %v911_v53 = vpack.i.b16 %v890_v42, %v856_v37  ;;  %v914_v54 = vshrl.u32 %v890_v42, 16  ;;  %v1234_v55 = vsel %vm1019_vm3, %v2634_v43, 0.0 }
 0x3e3   : > { %v899_v56 = vpack.i.b16 %v898_v51, %v897_v45  ;;  %v903_v57 = vpack.i.b16 %v891_v47, %v857_v40  ;;  %v906_v58 = vshrl.u32 %v891_v47, 16  ;;  %v919_v59 = vpack.i.b16 %v892_v49, %v858_v44  ;;  %1235 = vadd.xlane.f32.xlu0 %v1234_v55 }
 0x3e4   : > { %v915_v61 = vpack.i.b16 %v914_v54, %v913_v46  ;;  %v922_v62 = vshrl.u32 %v892_v49, 16  ;;  %v925_v63 = vcombine.low %v895_v50, %v911_v53 }
 0x3e5   : > { %v2641_v1 = vpop.eup %2050  ;;  %v907_v2 = vpack.i.b16 %v906_v58, %v905_v52  ;;  %v933_v4 = vcombine.low %v903_v57, %v919_v59 }
 0x3e6   : > { %v923_v5 = vpack.i.b16 %v922_v62, %v921_v60  ;;  %v950_v6 = vcombine.low %v899_v56, %v915_v61  ;;  %v1237_v7 = vsel %vm1019_vm3, %v2641_v1, 0.0  ;;  %v932_v8 = vrot.slane %v925_v63, %v2532_v27 }
 0x3e7   : > { %v940_v9 = vrot.slane %v933_v4, %v2532_v27  ;;  %1238 = vadd.xlane.f32.xlu0 %v1237_v7 }
 0x3e8   : > { %v958_v11 = vcombine.low %v907_v2, %v923_v5  ;;  %v957_v16 = vrot.slane %v950_v6, %v2532_v27 }
 0x3e9   : > { %v941_v13 = vcombine.low %v932_v8, %v940_v9 }
 0x3ea   : > { %v965_v17 = vrot.slane %v958_v11, %v2532_v27 }
 0x3eb   : > { %v948_v18 = vrot.slane %v941_v13, %v2534_v28 }
 0x3ec   : > { %v966_v19 = vcombine.low %v957_v16, %v965_v17 }
 0x3ed   : > { %v949_v20 = vcombine.high %v948_v18, %v2249_v48  ;;  %v979_v15 = vshrl.u32 %v948_v18, 16 }
 0x3ee   : > { %v973_v21 = vrot.slane %v966_v19, %v2534_v28 }
 0x3ef   : > { %v987_v25 = vshrl.u32 %v949_v20, 16 }
 0x3f0   : > { %v974_v10 = vcombine.high %v973_v21, %v2249_v48  ;;  %v977_v22 = vpack.i.b16 %v973_v21, %v948_v18  ;;  %v980_v14 = vshrl.u32 %v973_v21, 16 }
 0x3f2   : > { %v981_v12 = vpack.i.b16 %v980_v14, %v979_v15  ;;  %v985_v23 = vpack.i.b16 %v974_v10, %v949_v20  ;;  %v988_v26 = vshrl.u32 %v974_v10, 16  ;;  %991 = vst.msk [vmem:[#allocation4] sm:$0xf] %vm626_vm2, %v977_v22  ;;  %v2042_v22 = vld [vmem:[#allocation10] sm:$0xff]  }
 0x3f4   : > { %v989_v29 = vpack.i.b16 %v988_v26, %v987_v25  ;;  %992 = vst.msk [vmem:[#allocation4 + $0x4] sm:$0xf] %vm626_vm2, %v981_v12  ;;  %993 = vst.msk [vmem:[#allocation4 + $0x8] sm:$0xf] %vm626_vm2, %v985_v23 }
 0x3f6   : > { %994 = vst.msk [vmem:[#allocation4 + $0xc] sm:$0xf] %vm626_vm2, %v989_v29 }
 0x3f9   : > { %v1008_v30 = vld [vmem:[#allocation4] sm:$0xf] }
 0x3fa   : > { %v1257_v48 = vsel %vm1255_vm4, %v1008_v30, 0 }
 0x3fb   : > { %1911 = vmatpush3.bf16.msra.mxu1 %v1257_v48  ;;  %v1009_v31 = vld [vmem:[#allocation4 + $0x4] sm:$0xf]  ;;  %v1010_v41 = vld [vmem:[#allocation4 + $0x8] sm:$0xf]  ;;  %v2043_v48 = vld [vmem:[#allocation10 + $0x8] sm:$0xff]  }
 0x3fc   : > { %v1303_v33 = vsel %vm1255_vm4, %v1009_v31, 0  ;;  %1922 = vmatprep.subr.bf16.mxu1 %v2241_v0  ;;  %v1349_v46 = vsel %vm1255_vm4, %v1010_v41, 0 }
 0x3fd   : > { %1917 = vmatpush3.bf16.msra.mxu0 %v1303_v33  ;;  %v1011_v45 = vld [vmem:[#allocation4 + $0xc] sm:$0xf] }
 0x3fe   : > { %1928 = vmatprep.subr.bf16.mxu0 %v2241_v0 }
 0x468   : > { %v1230_v34 = vpop.xlane.xlu0 %1229 }
 0x469   : > { %2052 = vrcp.f32 %v1230_v34 }
 0x46a   : > { %v1233_v35 = vpop.xlane.xlu1 %1232 }
 0x46b   : > { %2054 = vrcp.f32 %v1233_v35 }
 0x470   : > { %v1236_v36 = vpop.xlane.xlu0 %1235 }
 0x471   : > { %2056 = vrcp.f32 %v1236_v36 }
 0x473   : > { %v2053_v37 = vpop.eup %2052 }
 0x474   : > { %v1244_v38 = vmul.f32 %v2053_v37, %v2619_v24  ;;  %v1239_v40 = vpop.xlane.xlu0 %1238  ;;  %v1395_v24 = vsel %vm1255_vm4, %v1011_v45, 0 }
 0x475   : > { %v2055_v39 = vpop.eup %2054  ;;  %2058 = vrcp.f32 %v1239_v40 }
 0x476   : > { %v1245_v42 = vmul.f32 %v2055_v39, %v2623_v32  ;;  %v1248_v44 = vpack.c.bf16 %v1244_v38, %v1244_v38 }
 0x478   : > { %1913 = vmatmul.mubr.msk.bf16.vlgmr.msra.gmra.mrb[8].mxu1 %vm1019_vm3, %v1248_v44  ;;  %v1249_v47 = vpack.c.bf16 %v1245_v42, %v1245_v42 }
 0x479   : > { %1923 = vmatpush3.bf16.msra.mxu1 %v1349_v46  ;;  %1924 = vmatprep.mubr.msk.bf16.mxu1 %vm2242_vm0, %v2241_v0 }
 0x47a   : > { %1919 = vmatmul.mubr.msk.bf16.vlgmr.msra.gmra.mrb[12].mxu0 %vm1019_vm3, %v1249_v47  ;;  %1934 = vmatprep.subr.bf16.mxu1 %v2241_v0 }
 0x47b   : > { %1929 = vmatpush3.bf16.msra.mxu0 %v1395_v24  ;;  %1930 = vmatprep.mubr.msk.bf16.mxu0 %vm2242_vm0, %v2241_v0  ;;  %v2057_v32 = vpop.eup %2056 }
 0x47c   : > { %v1246_v49 = vmul.f32 %v2057_v32, %v2634_v43 }
 0x47e   : > { %v1250_v50 = vpack.c.bf16 %v1246_v49, %v1246_v49 }
 0x47f   : > { %v2059_v51 = vpop.eup %2058 }
 0x480   : > { %v1247_v52 = vmul.f32 %v2059_v51, %v2641_v1  ;;  %1925 = vmatmul.mubr.msk.bf16.vlgmr.msra.gmra.mrb[12].mxu1 %vm1019_vm3, %v1250_v50 }
 0x481   : > { %1938 = vmatprep.mubr.msk.bf16.mxu1 %vm2242_vm0, %v2241_v0  ;;  %1935 = vmatpush3.bf16.msra.mxu1 %v2042_v22 }
 0x482   : > { %v1251_v53 = vpack.c.bf16 %v1247_v52, %v1247_v52  ;;  %1936 = vmatprep.subr.bf16.mxu1 %v2241_v0  ;;  %v1846_v52 = vld [vmem:[%s2770_s5] ss:$0 sm:$0xff] }
 0x484   : > { %1931 = vmatmul.mubr.msk.bf16.vlgmr.msra.gmra.mrb[16].mxu0 %vm1019_vm3, %v1251_v53 }
 0x485   : > { %1937 = vmatpush3.bf16.msra.mxu1 %v2043_v48 }
 0x54b   : > { %v1293_v54 = vpop.f32.mrb[8].mxu1 }
 0x54c   : > { %v1914_v55 = vpop.f32.mrb[9].mxu1 }
 0x54d   : > { %v1296_v56 = vpop.f32.mrb[10].mxu1  ;;  %v1339_v57 = vpop.f32.mrb[12].mxu0 }
 0x54e   : > { %v1915_v58 = vpop.f32.mrb[11].mxu1  ;;  %v1920_v59 = vpop.f32.mrb[13].mxu0 }
 0x54f   : > { %v1342_v60 = vpop.f32.mrb[14].mxu0 }
 0x550   : > { %v1921_v43 = vpop.f32.mrb[15].mxu0 }
 0x553   : > { %v1385_v61 = vpop.f32.mrb[12].mxu1 }
 0x554   : > { %v1437_v62 = vcombine.low %v1293_v54, %v1385_v61  ;;  %v1438_v63 = vcombine.high %v1293_v54, %v1385_v61  ;;  %v1926_v1 = vpop.f32.mrb[13].mxu1 }
 0x555   : > { %v1388_v2 = vpop.f32.mrb[14].mxu1 }
 0x556   : > { %v1927_v4 = vpop.f32.mrb[15].mxu1  ;;  %v1445_v11 = vrot.slane %v1437_v62, %v2532_v27  ;;  %v1452_v13 = vrot.slane %v1438_v63, %v2532_v27 }
 0x557   : > { %v1431_v5 = vpop.f32.mrb[16].mxu0 }
 0x558   : > { %v1453_v6 = vcombine.low %v1339_v57, %v1431_v5  ;;  %v1454_v7 = vcombine.high %v1339_v57, %v1431_v5  ;;  %v1932_v8 = vpop.f32.mrb[17].mxu0 }
 0x559   : > { %v1434_v9 = vpop.f32.mrb[18].mxu0 }
 0x55a   : > { %v1461_v16 = vrot.slane %v1453_v6, %v2532_v27  ;;  %v1468_v17 = vrot.slane %v1454_v7, %v2532_v27  ;;  %v1933_v18 = vpop.f32.mrb[19].mxu0  ;;  %v1851_v7 = vld [vmem:[%s2772_s7] ss:$0 sm:$0xff] }
 0x55c   : > { %v1469_v19 = vcombine.low %v1445_v11, %v1461_v16  ;;  %v1470_v20 = vcombine.high %v1445_v11, %v1461_v16  ;;  %v1485_v21 = vcombine.low %v1452_v13, %v1468_v17  ;;  %v1486_v10 = vcombine.high %v1452_v13, %v1468_v17 }
 0x55e   : > { %v1477_v15 = vrot.slane %v1469_v19, %v2534_v28  ;;  %v1484_v14 = vrot.slane %v1470_v20, %v2534_v28  ;;  %v1493_v12 = vrot.slane %v1485_v21, %v2534_v28  ;;  %v1500_v23 = vrot.slane %v1486_v10, %v2534_v28 }
 0x560   : > { %v1505_v25 = vcombine.low %v1477_v15, %v1484_v14  ;;  %v1844_v26 = vcombine.high %v1477_v15, %v1484_v14  ;;  %v1521_v29 = vcombine.low %v1493_v12, %v1500_v23  ;;  %v1845_v30 = vcombine.high %v1493_v12, %v1500_v23 }
 0x562   : > { %v1512_v31 = vrot.slane %v1505_v25, %v2532_v27  ;;  %v1520_v33 = vrot.slane %v1844_v26, %v2532_v27  ;;  %v1528_v34 = vrot.slane %v1521_v29, %v2532_v27  ;;  %v1536_v35 = vrot.slane %v1845_v30, %v2532_v27 }
 0x564   : > { %v1538_v36 = vcombine.high %v1512_v31, %v1520_v33  ;;  %v1554_v37 = vcombine.high %v1528_v34, %v1536_v35  ;;  %v1537_v38 = vcombine.low %v1512_v31, %v1520_v33  ;;  %v1553_v39 = vcombine.low %v1528_v34, %v1536_v35 }
 0x566   : > { %v1552_v0 = vrot.slane %v1538_v36, %v2534_v28  ;;  %v1568_v40 = vrot.slane %v1554_v37, %v2534_v28  ;;  %v1545_v41 = vrot.slane %v1537_v38, %v2534_v28  ;;  %v1561_v42 = vrot.slane %v1553_v39, %v2534_v28 }
 0x568   : > { %v1571_v44 = vcombine.low %v1552_v0, %v1568_v40  ;;  %v1570_v45 = vcombine.high %v1545_v41, %v1561_v42  ;;  %v1572_v46 = vcombine.high %v1552_v0, %v1568_v40  ;;  %v1569_v47 = vcombine.low %v1545_v41, %v1561_v42 }
 0x56a   : > { %1578 = vrot.lane.b32.xlu0 %v1571_v44, %s2251_s12  ;;  %1574 = vrot.lane.b32.xlu1 %v1570_v45, %s2252_s18  ;;  %s2794_s18 = sld [smem:[#allocation17_spill]] }
 0x56e   : > { %1582 = vrot.lane.b32.xlu1 %v1572_v46, %s2253_s13 }
 0x570   : > { %s2715_s13 = scalar_lea.hbm %s2794_s18, %s1853_s11 }
 0x5dc   : > { %v1575_v27 = vpop.permute.xlu1 %1574  ;;  %v1579_v24 = vpop.permute.xlu0 %1578 }
 0x5dd   : > { %v1585_v32 = vsel %vm1019_vm3, %v1569_v47, %v1575_v27 }
 0x5de   : > { %v1587_v50 = vsel %vm1586_vm5, %v1585_v32, %v1579_v24 }
 0x5e0   : > { %v1583_v49 = vpop.permute.xlu1 %1582 }
 0x5e1   : > { %v1589_v51 = vsel %vm1588_vm6, %v1587_v50, %v1583_v49 }
 0x5e2   : > { %v1590_v28 = vpack.c.bf16 %v1589_v51, %v1589_v51 }
 0x5e4   : > { %1939 = vmatmul.mubr.msk.bf16.vlgmr.msra.gmra.mrb[16].mxu1 %vm408_vm1, %v1590_v28 }
 0x6b7   : > { %v1652_v53 = vpop.f32.mrb[16].mxu1 }
 0x6b8   : > { %v1653_v54 = vadd.f32 %v1846_v52, %v1652_v53  ;;  %v1940_v55 = vpop.f32.mrb[17].mxu1 }
 0x6b9   : > { %v1655_v56 = vpop.f32.mrb[18].mxu1 }
 0x6ba   : > { %v1941_v57 = vpop.f32.mrb[19].mxu1  ;;  %v1660_v58 = vadd.f32 %v1653_v54, %v2505_v3  ;;  %v1850_v3 = vld [vmem:[%s2771_s6] ss:$0 sm:$0xff] }
 0x6bc   : > { %v1661_v59 = vsel %vm408_vm1, %v1660_v58, 0.0 }
 0x6bd   : > { %1662 = vadd.xlane.f32.xlu1 %v1661_v59 }
 0x74a   : > { %v1663_v60 = vpop.xlane.xlu1 %1662 }
 0x74b   : > { %v1665_v43 = vmul.f32 0.03125, %v1663_v60 }
 0x74d   : > { %v1666_v61 = vsub.f32 %v1660_v58, %v1665_v43 }
 0x74f   : > { %v1667_v62 = vmul.f32 %v1666_v61, %v1666_v61 }
 0x751   : > { %v1668_v63 = vsel %vm408_vm1, %v1667_v62, 0.0 }
 0x752   : > { %1669 = vadd.xlane.f32.xlu0 %v1668_v63 }
 0x7df   : > { %v1670_v1 = vpop.xlane.xlu0 %1669 }
 0x7e0   : > { %v1671_v2 = vmul.f32 0.03125, %v1670_v1 }
 0x7e2   : > { %v1672_v4 = vadd.f32 1e-12, %v1671_v2 }
 0x7e4   : > { %2060 = vrsqrt.f32 %v1672_v4 }
 0x7ee   : > { %v2061_v5 = vpop.eup %2060 }
 0x7ef   : > { %v1674_v6 = vmul.f32 %v2061_v5, %v1666_v61 }
 0x7f1   : > { %v1682_v8 = vmul.f32 %v1850_v3, %v1674_v6 }
 0x7f3   : > { %v1690_v9 = vadd.f32 %v1851_v7, %v1682_v8 }
 0x7f5   : > { %1691 = vst.msk [vmem:[%s374_s14] sm:$0xff] %vm408_vm1, %v1690_v9 }
 0x7f6   : > { %2161 = shalt.err (!%p2158_p0)
}
 0x7f7   : > { %s2162_s25 = scalar_lea.hbm %s2715_s13, 128  ;;  %s2166_s27 = scalar_lea.hbm %s2794_s18, 256 }
 0x7f8   : > { %p2163_p4 = scmp.ne.s32.totalorder %s2715_s13, %s2162_s25  ;;  %p2167_p7 = scmp.lt.u32.totalorder %s2715_s13, %s2794_s18 }
 0x7f9   : > { %p2168_p2 = scmp.lt.u32.totalorder %s2166_s27, %s2162_s25  ;;  %p2170_p12 = scmp.lt.u32.totalorder %s2162_s25, %s2715_s13 }
 0x7fa   : > { %p2164_p13 = pnand %p2163_p4, %p2795_p1 }
 0x7fb   : > { %p2169_p8 = por %p2168_p2, %p2167_p7 }
 0x7fc   : > { %p2165_p6 = pneg %p2164_p13 }
 0x7fd   : > { %p2171_p10 = por %p2170_p12, %p2169_p8 }
 0x7ff   : > { %p2172_p3 = pnand %p2171_p10, %p2165_p6 }
 0x801   : > { %2175 = shalt.err (!%p2172_p3)
}
 0x802   : > { %1952 = dma.vmem_to_hbm [thread:$0]  (%p2795_p1), %s2717_s26, 128, %s2715_s13, %s1693_s15  }
 0x803 PF: > { %s2796_s22 = sld [smem:[#allocation15_spill]]  ;;  %s2797_s12 = sld [smem:[#allocation16_spill]] }
 0x804   : > { %p2799_p9 = scmp.ge.s32.totalorder %s2234_s10, 2 }
 0x809   : > { %s1719_s17 = sand.u32 1, %s2796_s22   ;;  %p2798_p5 = scmp.ne.s32.totalorder %s2797_s12, 0 }
 0x80a   : > { %s1720_s30 = scalar_lea.sflag [#allocation7], %s1719_s17 }
 0x80b   : > { %p1966_p11 = pnand %p2799_p9, %p2798_p5 }
 0x80d   : > { %2209 = dma.done.wait (!%p1966_p11), %s1720_s30, 128  }
 0x80e   : > { %2211 = vsyncadd (!%p1966_p11), %s1720_s30, 4294967168  ;;  %s25_s10 = sadd.s32 1, %s2234_s10   ;;  %s2800_s27 = smov %s2218_s28 }
 0x80f   : > { %p22_p0 = scmp.ge.s32.totalorder %s25_s10, 4   ;;  %s2801_s28 = smov %s2222_s29 }
 0x810   : > { %s2802_s29 = smov %s2442_s24  ;;  %s2803_s30 = smov %s2230_s9 }
 0x811   : > { %s2804_s9 = smov %s2806_s16  ;;  %24 = sbr.rel (!%p22_p0) target bundleno = 9 (0x9), region = 114 }
 0x818   :  { %1725 = vsyncpa [#allocation6], 1 }
 0x819   :  { %1727 = vsyncpa [#allocation6 + $0x1], 1 }
 0x81a   :  { %1728 = vsyncpa [#allocation9], 1 }
 0x81b   :  { %1729 = vsyncpa [#allocation7], 1 }
 0x81c   :  { %1731 = vsyncpa [#allocation7 + $0x1], 1 }

</bundles_post_ra>
